<compile_context>
chip_gen: v5e
topology: v5e:2x2
jax: 0.10.0
libtpu: 0.0.40
codegen_flags: <defaults>
</compile_context>

<pallas_src>
import jax
import jax.numpy as jnp
from jax.experimental import pallas as pl
from jax.experimental.pallas import tpu as pltpu

LANES = 128
SUBLANES = 8
VMEM_LIMIT_BYTES = 64 * 1024 * 1024   # explicit scoped-VMEM limit (v5e default is 16 MiB)
VMEM_BUDGET_BYTES = 40 * 1024 * 1024  # tile-choice target; leaves headroom on v7x (64 MiB)


def _ceil_to(a: int, b: int) -> int:
  return (a + b - 1) // b * b


def _pad2(a, rows, cols):
  return jnp.pad(a, ((0, rows - a.shape[0]), (0, cols - a.shape[1])))


# --------------------------------- kernel ------------------------------------

def _make_edgeconv_kernel(num_mlp: int, mask_col: int):
  """Kernel body for a fixed MLP depth.

  refs: x_ref  [TQ, K, F]   bf16   per-query padded edge inputs;
                                   lane `mask_col` holds the validity bit
                                   (its weight row in w0 is zero).
        w0_ref [F, C0]      bf16   fused (pos|feat) first-layer weight
        b0_ref [1, C0]      f32    fused first-layer shift (BN folded)
        (w_i, b_i) * num_mlp              MLP layers (BN folded)
        out_ref [TQ, C_out]
  """

  def kernel(x_ref, w0_ref, b0_ref, *rest):
    mlp_refs = rest[:-1]
    out_ref = rest[-1]
    f32 = jnp.float32

    tq, kk, f = x_ref.shape
    x = x_ref[...].reshape(tq * kk, f)                        # bf16 [TQ*K, F]
    # Validity bit lives in a spare zero-weight feature column -> no separate
    # lane-sparse mask stream and no extra relayout.
    mask = x[:, mask_col:mask_col + 1].astype(f32)            # [TQ*K, 1]

    # Fused pos+feat first layer (Linear + eval-BN folded) + ReLU.
    h = jnp.dot(x, w0_ref[...], preferred_element_type=f32) + b0_ref[...]
    h = jnp.maximum(h, 0.0)
    if num_mlp > 0:
      h = h.astype(jnp.bfloat16)          # cast at the ReLU: single live copy

    # MLP stack: Linear + BN (folded) + ReLU, f32 accumulation on the MXU.
    for l in range(num_mlp):
      w = mlp_refs[2 * l][...]
      b = mlp_refs[2 * l + 1][...]
      h = jnp.maximum(jnp.dot(h, w, preferred_element_type=f32) + b, 0.0)
      if l < num_mlp - 1:
        h = h.astype(jnp.bfloat16)

    # scatter(edge_feat, e_query, reduce='max') == per-query max over the K
    # padded slots.  h >= 0 post-ReLU, so zeroing padded slots via the mask
    # reproduces torch_scatter's zero-filled max reduction exactly.
    c = h.shape[-1]
    h = (h * mask).reshape(tq, kk, c)
    out_ref[...] = jnp.max(h, axis=1).astype(out_ref.dtype)

  return kernel


# ----------------------------- tile-size selection ----------------------------

def _vmem_estimate(q_tile, k_pad, c_pads, weight_bytes, out_bytes):
  rows = q_tile * k_pad
  c_max = max(c_pads)
  est = 2 * rows * LANES * 2                 # x tile (bf16), minor dim lane-padded
  est += 2 * q_tile * c_pads[-1] * out_bytes  # output tile, double-buffered
  est += rows * c_max * (2 + 4)              # peak live activations (bf16 + f32 acc)
  est += 2 * weight_bytes                    # resident weights/biases
  return est


def _choose_q_tile(requested, n_rows_pad_min, k_pad, c_pads, weight_bytes,
                   out_bytes):
  t = _ceil_to(max(int(requested), SUBLANES), SUBLANES)
  t = min(t, n_rows_pad_min)
  while t > SUBLANES and _vmem_estimate(t, k_pad, c_pads, weight_bytes,
                                        out_bytes) > VMEM_BUDGET_BYTES:
    t = _ceil_to(t // 2, SUBLANES)
  # Prefer >= 2 grid steps so the "parallel" axis can use both v7x TensorCores.
  if t >= n_rows_pad_min and n_rows_pad_min >= 2 * SUBLANES:
    t = _ceil_to((n_rows_pad_min + 1) // 2, SUBLANES)
  return t


# --------------------------------- wrapper -----------------------------------

def edge_conv_pallas(fused, ref_bxyz, ref_feat, query_bxyz, e_ref, e_query,
                     *, q_tile: int = 512, k_max=None,
                     out_dtype=jnp.float32):
  """EdgeConv forward: fused matmuls + ReLU + per-query max in Pallas."""
  has_feat = ref_feat is not None
  n_q = int(query_bxyz.shape[0])
  n_edge = int(e_ref.shape[0])

  # ---- fold pos & feat branches into one first-layer matmul ----
  if has_feat:
    w0 = jnp.concatenate([fused["w_l0"], fused["w_f0"]], axis=0)   # [3+Cin, C0]
    b0 = fused["b_l0"] + fused["b_f0"]
  else:
    w0 = fused["w_l0"]
    b0 = fused["b_l0"]
  f_in = int(w0.shape[0])
  # Reserve one spare (zero-weight) column for the validity bit.
  f_pad = _ceil_to(f_in + 1, SUBLANES)
  mask_col = f_in
  c0_pad = _ceil_to(int(w0.shape[1]), LANES)

  w0_p = _pad2(w0, f_pad, c0_pad).astype(jnp.bfloat16)
  b0_p = _pad2(b0, 1, c0_pad).astype(jnp.float32)

  mlp_p = []
  c_pads = [c0_pad]
  last_pad = c0_pad
  c_out = int(w0.shape[1])
  for w, b in fused["mlp"]:
    c_out = int(w.shape[1])
    cp = _ceil_to(c_out, LANES)
    mlp_p.append((_pad2(w, last_pad, cp).astype(jnp.bfloat16),
                  _pad2(b, 1, cp).astype(jnp.float32)))
    last_pad = cp
    c_pads.append(cp)
  c_out_pad = last_pad

  weight_bytes = int(w0_p.size) * 2 + int(b0_p.size) * 4
  for w, b in mlp_p:
    weight_bytes += int(w.size) * 2 + int(b.size) * 4

  # ---- host-side restructuring: sort edges by query, pack per-query slots ----
  eq = e_query.astype(jnp.int32)
  er = e_ref.astype(jnp.int32)
  counts = jnp.bincount(eq, length=n_q)

  if k_max is None:
    # TODO(synk): data-dependent fallback; forces a device->host sync and a
    # recompile per degree bucket.  Pass a static k_max (kNN K) when known.
    km = int(jnp.max(counts)) if n_edge > 0 else 0
    k_pad = max(16, int(pl.next_power_of_2(max(km, 1))))
  else:
    k_pad = max(16, _ceil_to(int(k_max), 16))   # caller guarantees >= max degree

  order = jnp.argsort(eq)
  eq_s = eq[order]
  er_s = er[order]
  seg_start = jnp.cumsum(counts) - counts                       # [N_q]
  rank = jnp.arange(n_edge, dtype=jnp.int32) - seg_start[eq_s]  # slot within query
  slot = eq_s * k_pad + rank                                    # [E]

  pos_diff = (ref_bxyz[er_s] - query_bxyz[eq_s])[:, 1:4]        # [E, 3]
  feats = [pos_diff]
  if has_feat:
    feats.append(ref_feat[er_s])                                # [E, Cin]
  feats.append(jnp.ones((n_edge, 1), jnp.float32))              # validity bit
  x_e = jnp.concatenate(feats, axis=1)                          # [E, f_in+1]
  x_e = jnp.pad(x_e, ((0, 0), (0, f_pad - (f_in + 1)))).astype(jnp.bfloat16)

  # ---- query tiling (generation-aware VMEM budget) ----
  n_rows_pad_min = _ceil_to(max(n_q, 1), SUBLANES)
  out_bytes = jnp.dtype(out_dtype).itemsize
  q_tile = _choose_q_tile(q_tile, n_rows_pad_min, k_pad, c_pads, weight_bytes,
                          out_bytes)
  n_q_pad = _ceil_to(n_rows_pad_min, q_tile)

  x_packed = jnp.zeros((n_q_pad * k_pad, f_pad), jnp.bfloat16)
  x_packed = x_packed.at[slot].set(x_e).reshape(n_q_pad, k_pad, f_pad)

  # ---- pallas_call: grid over query tiles (parallel axis) ----
  def full_spec(shape):
    return pl.BlockSpec(shape, lambda i, _n=len(shape): (0,) * _n)

  inputs = [x_packed, w0_p, b0_p]
  in_specs = [
      pl.BlockSpec((q_tile, k_pad, f_pad), lambda i: (i, 0, 0)),
      full_spec(w0_p.shape),
      full_spec(b0_p.shape),
  ]
  for w, b in mlp_p:
    inputs += [w, b]
    in_specs += [full_spec(w.shape), full_spec(b.shape)]

  out = pl.pallas_call(
      _make_edgeconv_kernel(len(mlp_p), mask_col),
      out_shape=jax.ShapeDtypeStruct((n_q_pad, c_out_pad), out_dtype),
      grid=(n_q_pad // q_tile,),
      in_specs=in_specs,
      out_specs=pl.BlockSpec((q_tile, c_out_pad), lambda i: (i, 0)),
      compiler_params=pltpu.CompilerParams(
          dimension_semantics=("parallel",),
          vmem_limit_bytes=VMEM_LIMIT_BYTES),
  )(*inputs)

  return out[:n_q, :c_out]


# ----------------------- parameter construction (glue) ------------------------

def _bn_fold(bn):
  scale = bn["gamma"] / jnp.sqrt(bn["var"] + bn["eps"])
  shift = bn["beta"] - bn["mean"] * scale
  return scale, shift


def init_edge_conv_params(key, in_channel, mlp_channels):
  def bn(k, c):
    k1, k2, k3, k4 = jax.random.split(k, 4)
    return dict(gamma=1.0 + 0.1 * jax.random.normal(k1, (c,), jnp.float32),
                beta=0.05 * jax.random.normal(k2, (c,), jnp.float32),
                mean=0.1 * jax.random.normal(k3, (c,), jnp.float32),
                var=jax.random.uniform(k4, (c,), jnp.float32,
                                       minval=0.5, maxval=1.5),
                eps=1e-3)

  keys = jax.random.split(key, 4 + 2 * len(mlp_channels))
  c0 = mlp_channels[0]
  p = {
      "mlp_l0_w": 0.3 * jax.random.normal(keys[0], (c0, 3), jnp.float32),
      "norm_l0": bn(keys[1], c0),
  }
  if in_channel > 0:
    p["mlp_f0_w"] = 0.3 * jax.random.normal(keys[2], (c0, in_channel), jnp.float32)
    p["norm_f0"] = bn(keys[3], c0)
  p["mlp_convs"] = []
  last = c0
  for i, c in enumerate(mlp_channels[1:]):
    kw, kb = keys[4 + 2 * i], keys[5 + 2 * i]
    p["mlp_convs"].append(dict(
        w=0.3 * jax.random.normal(kw, (c, last), jnp.float32),
        b=0.05 * jax.random.normal(kb, (c,), jnp.float32),
        bn=bn(jax.random.fold_in(kb, 7), c)))
    last = c
  return p


def fold_edge_conv_params(p, in_channel):
  s0, t0 = _bn_fold(p["norm_l0"])
  fused = {
      "w_l0": p["mlp_l0_w"].T * s0[None, :],        # [3, C0]
      "b_l0": t0[None, :],                          # [1, C0]
      "mlp": [],
  }
  if in_channel > 0:
    sf, tf = _bn_fold(p["norm_f0"])
    fused["w_f0"] = p["mlp_f0_w"].T * sf[None, :]   # [Cin, C0]
    fused["b_f0"] = tf[None, :]
  for layer in p["mlp_convs"]:
    s, t = _bn_fold(layer["bn"])
    fused["mlp"].append((layer["w"].T * s[None, :],
                         (layer["b"] * s + t)[None, :]))
  return fused


def edge_conv_reference(fused, ref_bxyz, ref_feat, query_bxyz, e_ref, e_query):
  """Plain-JAX reference mirroring the PyTorch forward (eval-mode BN folded)."""
  pos_diff = (ref_bxyz[e_ref] - query_bxyz[e_query])[:, 1:4]
  x = pos_diff @ fused["w_l0"] + fused["b_l0"]
  if ref_feat is not None:
    rf = ref_feat @ fused["w_f0"] + fused["b_f0"]
    x = x + rf[e_ref]
  x = jax.nn.relu(x)
  for w, b in fused["mlp"]:
    x = jax.nn.relu(x @ w + b)
  seg = jax.ops.segment_max(x, e_query, num_segments=query_bxyz.shape[0])
  return jnp.maximum(seg, 0.0)   # torch_scatter zero-fills empty segments


if __name__ == "__main__":
  key = jax.random.PRNGKey(0)
  k_p, k_rb, k_rf, k_qb, k_er, k_eq = jax.random.split(key, 6)

  in_channel = 4                      # conv_cfg['INPUT_CHANNEL']
  mlp_channels = [32, 64]             # conv_cfg['MLP_CHANNELS']
  n_ref, n_query, n_edge = 32, 16, 64

  params = init_edge_conv_params(k_p, in_channel, mlp_channels)
  fused = fold_edge_conv_params(params, in_channel)

  ref_bxyz = jnp.concatenate(
      [jnp.zeros((n_ref, 1), jnp.float32),
       jax.random.normal(k_rb, (n_ref, 3), jnp.float32)], axis=1)
  ref_feat = jax.random.normal(k_rf, (n_ref, in_channel), jnp.float32)
  query_bxyz = jnp.concatenate(
      [jnp.zeros((n_query, 1), jnp.float32),
       jax.random.normal(k_qb, (n_query, 3), jnp.float32)], axis=1)
  e_ref = jax.random.randint(k_er, (n_edge,), 0, n_ref, jnp.int32)
  e_query = jax.random.randint(k_eq, (n_edge,), 0, n_query, jnp.int32)

  out = edge_conv_pallas(fused, ref_bxyz, ref_feat, query_bxyz,
                         e_ref, e_query)
  out = jax.block_until_ready(out)

  ref_out = edge_conv_reference(fused, ref_bxyz, ref_feat, query_bxyz,
                                e_ref, e_query)
  assert out.shape == (n_query, mlp_channels[-1]), out.shape
  assert jnp.allclose(out, ref_out, rtol=5e-2, atol=5e-2), \
      float(jnp.max(jnp.abs(out - ref_out)))

  print("KERNEL_OK")
</pallas_src>

<mosaic_0001>
module attributes {stable_mosaic.version = 11 : i64} {
  func.func @kernel(%arg0: i32, %arg1: memref<8x16x8xbf16, #tpu.memory_space<vmem>>, %arg2: memref<8x128xbf16, #tpu.memory_space<vmem>>, %arg3: memref<1x128xf32, #tpu.memory_space<vmem>>, %arg4: memref<128x128xbf16, #tpu.memory_space<vmem>>, %arg5: memref<1x128xf32, #tpu.memory_space<vmem>>, %arg6: memref<8x128xf32, #tpu.memory_space<vmem>>) attributes {dimension_semantics = [#tpu.dimension_semantics<parallel>], iteration_bounds = array<i64: 2>, scalar_prefetch = 0 : i64, scratch_operands = 0 : i64, tpu.core_type = #tpu.core_type<tc>, window_params = [{transform_indices = @transform_0, window_bounds = array<i64: 8, 16, 8>}, {pipeline_mode = #tpu.pipeline_mode<synchronous>, transform_indices = @transform_1, window_bounds = array<i64: 8, 128>}, {pipeline_mode = #tpu.pipeline_mode<synchronous>, transform_indices = @transform_2, window_bounds = array<i64: 1, 128>}, {pipeline_mode = #tpu.pipeline_mode<synchronous>, transform_indices = @transform_3, window_bounds = array<i64: 128, 128>}, {pipeline_mode = #tpu.pipeline_mode<synchronous>, transform_indices = @transform_4, window_bounds = array<i64: 1, 128>}, {transform_indices = @transform_5, window_bounds = array<i64: 8, 128>}]} {
    %c0 = arith.constant 0 : index
    %c0_0 = arith.constant 0 : index
    %c0_1 = arith.constant 0 : index
    %0 = vector.load %arg1[%c0, %c0_0, %c0_1] : memref<8x16x8xbf16, #tpu.memory_space<vmem>>, vector<8x16x8xbf16>
    %1 = vector.shape_cast %0 : vector<8x16x8xbf16> to vector<128x8xbf16>
    %2 = vector.extract_strided_slice %1 {offsets = [0, 7], sizes = [128, 1], strides = [1, 1]} : vector<128x8xbf16> to vector<128x1xbf16>
    %3 = arith.extf %2 : vector<128x1xbf16> to vector<128x1xf32>
    %c0_2 = arith.constant 0 : index
    %c0_3 = arith.constant 0 : index
    %4 = vector.load %arg2[%c0_2, %c0_3] : memref<8x128xbf16, #tpu.memory_space<vmem>>, vector<8x128xbf16>
    %cst = arith.constant dense<0.000000e+00> : vector<128x128xf32>
    %5 = tpu.matmul %1, %4, %cst {dimension_numbers = #tpu.dot_dimension_numbers<[1], [0], [0], [1], [0, 0, 1, 1], [], []>} : vector<128x8xbf16>, vector<8x128xbf16>, vector<128x128xf32> -> vector<128x128xf32>
    %c0_4 = arith.constant 0 : index
    %c0_5 = arith.constant 0 : index
    %6 = vector.load %arg3[%c0_4, %c0_5] : memref<1x128xf32, #tpu.memory_space<vmem>>, vector<1x128xf32>
    %7 = vector.broadcast %6 : vector<1x128xf32> to vector<128x128xf32>
    %8 = arith.addf %5, %7 : vector<128x128xf32>
    %cst_6 = arith.constant 0.000000e+00 : f32
    %9 = vector.broadcast %cst_6 : f32 to vector<128x128xf32>
    %10 = arith.maximumf %8, %9 : vector<128x128xf32>
    %11 = arith.truncf %10 : vector<128x128xf32> to vector<128x128xbf16>
    %c0_7 = arith.constant 0 : index
    %c0_8 = arith.constant 0 : index
    %12 = vector.load %arg4[%c0_7, %c0_8] : memref<128x128xbf16, #tpu.memory_space<vmem>>, vector<128x128xbf16>
    %c0_9 = arith.constant 0 : index
    %c0_10 = arith.constant 0 : index
    %13 = vector.load %arg5[%c0_9, %c0_10] : memref<1x128xf32, #tpu.memory_space<vmem>>, vector<1x128xf32>
    %cst_11 = arith.constant dense<0.000000e+00> : vector<128x128xf32>
    %14 = tpu.matmul %11, %12, %cst_11 {dimension_numbers = #tpu.dot_dimension_numbers<[1], [0], [0], [1], [0, 0, 1, 1], [], []>} : vector<128x128xbf16>, vector<128x128xbf16>, vector<128x128xf32> -> vector<128x128xf32>
    %15 = vector.broadcast %13 : vector<1x128xf32> to vector<128x128xf32>
    %16 = arith.addf %14, %15 : vector<128x128xf32>
    %cst_12 = arith.constant 0.000000e+00 : f32
    %17 = vector.broadcast %cst_12 : f32 to vector<128x128xf32>
    %18 = arith.maximumf %16, %17 : vector<128x128xf32>
    %19 = vector.broadcast %3 : vector<128x1xf32> to vector<128x128xf32>
    %20 = arith.mulf %18, %19 : vector<128x128xf32>
    %21 = vector.shape_cast %20 : vector<128x128xf32> to vector<8x16x128xf32>
    %cst_13 = arith.constant dense<0xFF800000> : vector<8x128xf32>
    %22 = vector.multi_reduction <maximumf>, %21, %cst_13 [1] : vector<8x16x128xf32> to vector<8x128xf32>
    %c0_14 = arith.constant 0 : index
    %c0_15 = arith.constant 0 : index
    %23 = vector.load %arg6[%c0_14, %c0_15] : memref<8x128xf32, #tpu.memory_space<vmem>>, vector<8x128xf32>
    tpu.vector_store %arg6[%c0_14, %c0_15], %22 {strides = array<i32>} : memref<8x128xf32, #tpu.memory_space<vmem>>, vector<8x128xf32>,
    return
  }
  func.func @transform_0(%arg0: i32) -> (i32, i32, i32) {
    %c0_i32 = arith.constant 0 : i32
    %c0_i32_0 = arith.constant 0 : i32
    %c0_i32_1 = arith.constant 0 : i32
    return %arg0, %c0_i32, %c0_i32_0 : i32, i32, i32
  }
  func.func @transform_1(%arg0: i32) -> (i32, i32) {
    %c0_i32 = arith.constant 0 : i32
    %c0_i32_0 = arith.constant 0 : i32
    %c0_i32_1 = arith.constant 0 : i32
    return %c0_i32, %c0_i32_0 : i32, i32
  }
  func.func @transform_2(%arg0: i32) -> (i32, i32) {
    %c0_i32 = arith.constant 0 : i32
    %c0_i32_0 = arith.constant 0 : i32
    %c0_i32_1 = arith.constant 0 : i32
    return %c0_i32, %c0_i32_0 : i32, i32
  }
  func.func @transform_3(%arg0: i32) -> (i32, i32) {
    %c0_i32 = arith.constant 0 : i32
    %c0_i32_0 = arith.constant 0 : i32
    %c0_i32_1 = arith.constant 0 : i32
    return %c0_i32, %c0_i32_0 : i32, i32
  }
  func.func @transform_4(%arg0: i32) -> (i32, i32) {
    %c0_i32 = arith.constant 0 : i32
    %c0_i32_0 = arith.constant 0 : i32
    %c0_i32_1 = arith.constant 0 : i32
    return %c0_i32, %c0_i32_0 : i32, i32
  }
  func.func @transform_5(%arg0: i32) -> (i32, i32) {
    %c0_i32 = arith.constant 0 : i32
    %c0_i32_0 = arith.constant 0 : i32
    return %arg0, %c0_i32 : i32, i32
  }
}

</mosaic_0001>

<bundles_post_ra>
// kernel: tpu_custom_call.1
= control target key start
LH: loop header
LB: loop body
LE: loop exit
PB: predicated region body
PF: predicated region fallthrough
CT: control target
= control target key end

     0   :  { %10 = vsyncpa [#allocation3], 0  ;;  %s1268_s0 = inlined_call_operand.vmem [shape: bf16[16,16,8], index: 0, kind: input, shape index: {}]   ;;  %s1269_s1 = inlined_call_operand.vmem [shape: bf16[8,128], index: 1, kind: input, shape index: {}]   ;;  %s1270_s2 = inlined_call_operand.vmem [shape: f32[1,128], index: 2, kind: input, shape index: {}]   ;;  %s1271_s3 = inlined_call_operand.vmem [shape: bf16[128,128], index: 3, kind: input, shape index: {}]   ;;  %s1272_s4 = inlined_call_operand.vmem [shape: f32[1,128], index: 4, kind: input, shape index: {}]   ;;  %s1273_s5 = inlined_call_operand.hbm [shape: f32[16,128], index: 5, kind: output, shape index: {}]  }
   0x1   :  { %12 = vsyncpa [#allocation3 + $0x1], 0  ;;  %s1082_s18 = smov 0   ;;  %s1084_s19 = smov 0  }
   0x2   :  { %s1086_s20 = smov 0   ;;  %s1088_s21 = smov 0  }
   0x3 LB: > { %s791_s22 = sadd.s32 4294967295, %s1049_s21   ;;  %s792_s23 = sadd.s32 4294967294, %s1049_s21   ;;  %s1049_s21 = sphi %s1088_s21, %s1279_s21   ;;  %s1045_s20 = sphi %s1086_s20, %s1278_s20   ;;  %s1041_s19 = sphi %s1084_s19, %s1277_s19   ;;  %s1037_s18 = sphi %s1082_s18, %s1276_s18  }
   0x4   : > { %s1105_s24 = sadd.s32 1, %s1049_s21   ;;  %s135_s25 = sadd.s32 1, %s1045_s20 }
   0x5   : > { %s132_s26 = ssub.s32 %s1049_s21, %s1105_s24  ;;  %p145_p0 = scmp.ne.s32.totalorder %s1045_s20, %s1041_s19 }
   0x6   : > { %p133_p1 = scmp.eq.s32.totalorder %s132_s26, 0  ;;  %p146_p2 = scmp.eq.s32.totalorder %s791_s22, 1 }
   0x7   : > { %p151_p3 = scmp.ne.s32.totalorder %s1041_s19, %s1037_s18  ;;  %p152_p4 = scmp.eq.s32.totalorder %s792_s23, 1 }
   0x8   : > { %s1115_s27 = scalar_select %p133_p1, %s1045_s20, %s135_s25  }
   0x9   : > { %p1117_p5 = por %p146_p2, %p145_p0  ;;  %p1121_p6 = por %p152_p4, %p151_p3 }
   0xa   : > { %p795_p7 = scmp.ge.s32.totalorder %s1049_s21, 1  ;;  %p192_p8 = scmp.lt.s32.totalorder %s1049_s21, 3 }
   0xc   : > { %p193_p9 = pnand %p795_p7, %p192_p8 }
   0xd   : > { %s1130_s7 = sshll.u32 (!%p193_p9), %s791_s22, 3  ;;  %s218_s17 = sand.u32 (!%p193_p9), 1, %s1041_s19  }
   0xe   : > { %196 = sbr.rel (%p193_p9) target bundleno = 440 (0x1b8), region = 40  ;;  %p222_p10 = scmp.lt.s32.totalorder (!%p193_p9), %s1130_s7, 15 }
   0xf   : > { %s1232_s22 = sshll.u32 (!%p193_p9), %s218_s17, 3  ;;  %s728_s26 = scalar_lea.hbm (!%p193_p9), %s1273_s5, %s1130_s7 }
  0x10   : > { %s220_s30 = scalar_lea.vmem (!%p193_p9), [#allocation2], %s1232_s22  ;;  %s1007_s14 = scalar_lea.hbm (!%p193_p9), %s1273_s5, 16 }
  0x11   : > { %s730_s6 = sshll.u32 (!%p193_p9), %s220_s30, 4  ;;  %s731_s6 = int_to_ptr.vmem [resolvable:$true] %s730_s6 }
  0x13   : > { %v261_v0 = vld [vmem:[%s1269_s1] sm:$0xf]  ;;  %vm331_vm0 = vcmask 1043456   ;;  %s223_s8 = scalar_select %p222_p10, %s1130_s7, 15  ;;  %vm306_vm1 = vcmask 64512   ;;  %v892_v6 = vld [vmem:[%s1271_s3 + $0x38] sm:$0xff] }
  0x14   : > { %v333_v1 = vsel %vm331_vm0, %v261_v0, 0  ;;  %476 = vmatpush.bf16.msra.mxu1 %v892_v6  ;;  %v891_v7 = vld [vmem:[%s1271_s3 + $0x30] sm:$0xff]  ;;  %894 = vmatpush.bf16.msra.mxu2 %v892_v6  ;;  %v890_v8 = vld [vmem:[%s1271_s3 + $0x28] sm:$0xff]  ;;  %v889_v10 = vld [vmem:[%s1271_s3 + $0x20] sm:$0xff]  ;;  %v1051_v22 = vmov 7   ;;  %vm701_vm2 = vcmask 1041409  }
  0x15   : > { %342 = vmatpush.bf16.msra.mxu0 %v333_v1  ;;  %893 = vmatpush.bf16.msra.mxu3 %v333_v1  ;;  %s876_s9 = sshll.u32 %s223_s8, 3  ;;  %v888_v14 = vld [vmem:[%s1271_s3 + $0x18] sm:$0xff]  ;;  %v887_v15 = vld [vmem:[%s1271_s3 + $0x10] sm:$0xff]  ;;  %v886_v16 = vld [vmem:[%s1271_s3 + $0x8] sm:$0xff]  ;;  %vm703_vm3 = vcmask 1042434   ;;  %vm705_vm4 = vcmask 1043459  }
  0x16   : > { %s1137_s12 = scalar_lea.vmem %s1268_s0, %s876_s9  ;;  %v885_v17 = vld [vmem:[%s1271_s3] sm:$0xff]  ;;  %942 = vset.pattern.permute.xlu0 %v1051_v22  ;;  %953 = vset.pattern.permute.xlu1 %v1051_v22  ;;  %vm707_vm5 = vcmask 1044484   ;;  %vm709_vm6 = vcmask 1045509   ;;  %vm711_vm7 = vcmask 1046534   ;;  %s732_s8 = sshll.u32 %s728_s26, 4  ;;  %vm713_vm8 = vcmask 1047559   ;;  %s733_s8 = int_to_ptr.hbm [resolvable:$true] %s732_s8 }
  0x17   : > { %v877_v2 = vld [vmem:[%s1137_s12] sm:$0xff]  ;;  %v878_v3 = vld [vmem:[%s1137_s12 + $0x8] sm:$0xff]  ;;  %v879_v4 = vld [vmem:[%s1137_s12 + $0x10] sm:$0xff]  ;;  %964 = vset.pattern.permute.xlu2 %v1051_v22  ;;  %s718_s7 = scalar_lea.sflag [#allocation3], %s218_s17  ;;  %s1001_s9 = sshra.s32 %s733_s8, 4  ;;  %s1002_s9 = int_to_ptr.hbm [resolvable:$true] %s1001_s9 }
  0x18   : > { %832 = vmatmul.msk.bf16.vlgmr.msra.gmra.mxu0 %vm306_vm1, %v877_v2  ;;  %v882_v5 = vld [vmem:[%s1137_s12 + $0x28] sm:$0xff]  ;;  %477 = vmatpush.bf16.msra.mxu1 %v891_v7  ;;  %v880_v9 = vld [vmem:[%s1137_s12 + $0x18] sm:$0xff]  ;;  %v883_v11 = vld [vmem:[%s1137_s12 + $0x30] sm:$0xff]  ;;  %s1003_s10 = scalar_lea.hbm %s1002_s9, 8  ;;  %p1008_p0 = scmp.lt.s32.totalorder %s1002_s9, %s1273_s5 }
  0x19   : > { %837 = vmatmul.msk.bf16.vlgmr.msra.gmra.mxu3 %vm306_vm1, %v882_v5  ;;  %895 = vmatpush.bf16.msra.mxu2 %v891_v7  ;;  %v881_v12 = vld [vmem:[%s1137_s12 + $0x20] sm:$0xff]  ;;  %v884_v13 = vld [vmem:[%s1137_s12 + $0x38] sm:$0xff]  ;;  %v231_v26 = vld [vmem:[%s1137_s12 + $0x8] sm:$0xff]   ;;  %p1004_p11 = scmp.ne.s32.totalorder %s1002_s9, %s1003_s10  ;;  %p1009_p1 = scmp.lt.s32.totalorder %s1007_s14, %s1003_s10 }
  0x1a   : > { %v229_v18 = vld [vmem:[%s1137_s12] sm:$0xff]   ;;  %v247_v28 = vunpack.c.l.bf16 %v231_v26  ;;  %v248_v29 = vunpack.c.h.bf16 %v231_v26  ;;  %v233_v37 = vld [vmem:[%s1137_s12 + $0x10] sm:$0xff]   ;;  %v235_v48 = vld [vmem:[%s1137_s12 + $0x18] sm:$0xff]  }
  0x1b   : > { %v245_v19 = vunpack.c.l.bf16 %v229_v18  ;;  %v246_v20 = vunpack.c.h.bf16 %v229_v18  ;;  %v1183_v24 = vld [vmem:[%s1270_s2] ss:$0 sm:$0xff]  ;;  %v249_v39 = vunpack.c.l.bf16 %v233_v37  ;;  %v250_v40 = vunpack.c.h.bf16 %v233_v37  ;;  %p1005_p12 = pnand %p1004_p11, %p1117_p5  ;;  %p1010_p2 = por %p1009_p1, %p1008_p0 }
  0x1c   : > { %478 = vmatpush.bf16.msra.mxu1 %v890_v8  ;;  %v948_v31 = vpack.i.bf16 %v248_v29, %v247_v28  ;;  %v251_v50 = vunpack.c.l.bf16 %v235_v48  ;;  %v252_v51 = vunpack.c.h.bf16 %v235_v48 }
  0x1d   : > { %896 = vmatpush.bf16.msra.mxu2 %v890_v8  ;;  %v943_v21 = vpack.i.bf16 %v246_v20, %v245_v19  ;;  %v954_v42 = vpack.i.bf16 %v250_v40, %v249_v39  ;;  %v241_v19 = vld [vmem:[%s1137_s12 + $0x30] sm:$0xff]   ;;  %p1006_p13 = pneg %p1005_p12 }
  0x1e   : > { %v959_v53 = vpack.i.bf16 %v252_v51, %v251_v50  ;;  %v258_v22 = vunpack.c.h.bf16 %v241_v19 }
  0x1f   : > { %944 = vperm.xlu0 %942, %v943_v21   ;;  %955 = vperm.xlu1 %953, %v954_v42   ;;  %v257_v21 = vunpack.c.l.bf16 %v241_v19  ;;  %p1011_p3 = pnand %p1010_p2, %p1006_p13 }
  0x20   : > { %479 = vmatpush.bf16.msra.mxu1 %v889_v10 }
  0x21   : > { %897 = vmatpush.bf16.msra.mxu2 %v889_v10  ;;  %v975_v26 = vpack.i.bf16 %v258_v22, %v257_v21 }
  0x24   : > { %480 = vmatpush.bf16.msra.mxu1 %v888_v14 }
  0x25   : > { %898 = vmatpush.bf16.msra.mxu2 %v888_v14 }
  0x27   : > { %949 = vperm.xlu0 %942, %v948_v31   ;;  %960 = vperm.xlu1 %953, %v959_v53  }
  0x28   : > { %833 = vmatmul.msk.bf16.gmra.mxu0 %vm306_vm1, %v878_v3  ;;  %481 = vmatpush.bf16.msra.mxu1 %v887_v15 }
  0x29   : > { %838 = vmatmul.msk.bf16.gmra.mxu3 %vm306_vm1, %v883_v11  ;;  %899 = vmatpush.bf16.msra.mxu2 %v887_v15 }
  0x2c   : > { %482 = vmatpush.bf16.msra.mxu1 %v886_v16 }
  0x2d   : > { %900 = vmatpush.bf16.msra.mxu2 %v886_v16 }
  0x2f   : > { %976 = vperm.xlu0 %942, %v975_v26  }
  0x30   : > { %483 = vmatpush.bf16.msra.mxu1 %v885_v17 }
  0x31   : > { %901 = vmatpush.bf16.msra.mxu2 %v885_v17 }
  0x38   : > { %834 = vmatmul.msk.bf16.gmra.mxu0 %vm306_vm1, %v879_v4 }
  0x39   : > { %839 = vmatmul.msk.bf16.gmra.mxu3 %vm306_vm1, %v884_v13 }
  0x48   : > { %835 = vmatmul.msk.bf16.gmra.mxu0 %vm306_vm1, %v880_v9  ;;  %v237_v9 = vld [vmem:[%s1137_s12 + $0x20] sm:$0xff]  }
  0x49   : > { %v253_v10 = vunpack.c.l.bf16 %v237_v9  ;;  %v254_v11 = vunpack.c.h.bf16 %v237_v9 }
  0x58   : > { %836 = vmatmul.msk.bf16.gmra.mxu0 %vm306_vm1, %v881_v12  ;;  %v965_v12 = vpack.i.bf16 %v254_v11, %v253_v10 }
  0x5a   : > { %966 = vperm.xlu2 %964, %v965_v12  }
  0x95   : > { %v344_v23 = vpop.f32.mrf.mxu0 }
  0x96   : > { %v345_v25 = vadd.f32 %v1183_v24, %v344_v23  ;;  %v239_v23 = vld [vmem:[%s1137_s12 + $0x28] sm:$0xff]  }
  0x97   : > { %v256_v28 = vunpack.c.h.bf16 %v239_v23 }
  0x98   : > { %v384_v32 = vmax.f32 %v345_v25, 0.0  ;;  %v243_v25 = vld [vmem:[%s1137_s12 + $0x38] sm:$0xff]  }
  0x99   : > { %v259_v29 = vunpack.c.l.bf16 %v243_v25 }
  0x9c   : > { %v369_v1 = vpop.f32.mrf.mxu3 }
  0x9d   : > { %v346_v27 = vpop.f32.mrf.mxu0  ;;  %v370_v14 = vadd.f32 %v1183_v24, %v369_v1 }
  0x9e   : > { %v347_v30 = vadd.f32 %v1183_v24, %v346_v27  ;;  %v255_v27 = vunpack.c.l.bf16 %v239_v23 }
  0x9f   : > { %v394_v16 = vmax.f32 %v370_v14, 0.0 }
  0xa0   : > { %v385_v33 = vmax.f32 %v347_v30, 0.0  ;;  %v260_v30 = vunpack.c.h.bf16 %v243_v25  ;;  %v970_v31 = vpack.i.bf16 %v256_v28, %v255_v27 }
  0xa2   : > { %v400_v34 = vpack.c.bf16 %v385_v33, %v384_v32  ;;  %v980_v32 = vpack.i.bf16 %v260_v30, %v259_v29  ;;  %971 = vperm.xlu2 %964, %v970_v31  }
  0xa4   : > { %484 = vmatmul.bf16.vlgmr.msra.gmra.mxu1 %v400_v34  ;;  %v371_v5 = vpop.f32.mrf.mxu3  ;;  %981 = vperm.xlu1 %953, %v980_v32  }
  0xa5   : > { %v349_v35 = vpop.f32.mrf.mxu0  ;;  %v372_v15 = vadd.f32 %v1183_v24, %v371_v5 }
  0xa6   : > { %v350_v36 = vadd.f32 %v1183_v24, %v349_v35 }
  0xa7   : > { %v395_v17 = vmax.f32 %v372_v15, 0.0 }
  0xa8   : > { %v386_v43 = vmax.f32 %v350_v36, 0.0 }
  0xa9   : > { %v405_v18 = vpack.c.bf16 %v395_v17, %v394_v16 }
  0xac   : > { %v374_v13 = vpop.f32.mrf.mxu3 }
  0xad   : > { %v351_v38 = vpop.f32.mrf.mxu0  ;;  %v375_v33 = vadd.f32 %v1183_v24, %v374_v13 }
  0xae   : > { %v352_v41 = vadd.f32 %v1183_v24, %v351_v38 }
  0xaf   : > { %v396_v36 = vmax.f32 %v375_v33, 0.0 }
  0xb0   : > { %v387_v44 = vmax.f32 %v352_v41, 0.0 }
  0xb2   : > { %v401_v45 = vpack.c.bf16 %v387_v44, %v386_v43 }
  0xb4   : > { %489 = vmatmul.bf16.gmra.mxu1 %v401_v45  ;;  %v376_v20 = vpop.f32.mrf.mxu3 }
  0xb5   : > { %v354_v46 = vpop.f32.mrf.mxu0  ;;  %v377_v34 = vadd.f32 %v1183_v24, %v376_v20 }
  0xb6   : > { %v355_v47 = vadd.f32 %v1183_v24, %v354_v46 }
  0xb7   : > { %v397_v37 = vmax.f32 %v377_v34, 0.0 }
  0xb8   : > { %v388_v54 = vmax.f32 %v355_v47, 0.0 }
  0xb9   : > { %v406_v38 = vpack.c.bf16 %v397_v37, %v396_v36 }
  0xbc   : > { %v379_v35 = vpop.f32.mrf.mxu3 }
  0xbd   : > { %v356_v49 = vpop.f32.mrf.mxu0  ;;  %v380_v40 = vadd.f32 %v1183_v24, %v379_v35 }
  0xbe   : > { %v357_v52 = vadd.f32 %v1183_v24, %v356_v49 }
  0xbf   : > { %v398_v42 = vmax.f32 %v380_v40, 0.0 }
  0xc0   : > { %v389_v55 = vmax.f32 %v357_v52, 0.0 }
  0xc2   : > { %v402_v56 = vpack.c.bf16 %v389_v55, %v388_v54  ;;  %v945_v55 = vpop.permute.xlu0 %944 }
  0xc4   : > { %494 = vmatmul.bf16.gmra.mxu1 %v402_v56  ;;  %v381_v39 = vpop.f32.mrf.mxu3 }
  0xc5   : > { %v359_v57 = vpop.f32.mrf.mxu0  ;;  %v382_v41 = vadd.f32 %v1183_v24, %v381_v39 }
  0xc6   : > { %v360_v58 = vadd.f32 %v1183_v24, %v359_v57  ;;  %v956_v57 = vpop.permute.xlu1 %955 }
  0xc7   : > { %v399_v43 = vmax.f32 %v382_v41, 0.0  ;;  %v957_v14 = vunpack.i.l.bf16 %v956_v57  ;;  %v958_v17 = vunpack.i.h.bf16 %v956_v57 }
  0xc8   : > { %v390_v61 = vmax.f32 %v360_v58, 0.0 }
  0xc9   : > { %v407_v44 = vpack.c.bf16 %v399_v43, %v398_v42 }
  0xcd   : > { %v361_v59 = vpop.f32.mrf.mxu0 }
  0xce   : > { %v362_v60 = vadd.f32 %v1183_v24, %v361_v59  ;;  %v961_v10 = vpop.permute.xlu1 %960 }
  0xcf   : > { %v962_v22 = vunpack.i.l.bf16 %v961_v10  ;;  %v963_v26 = vunpack.i.h.bf16 %v961_v10 }
  0xd0   : > { %v391_v62 = vmax.f32 %v362_v60, 0.0 }
  0xd2   : > { %v403_v63 = vpack.c.bf16 %v391_v62, %v390_v61  ;;  %v967_v61 = vpop.permute.xlu2 %966 }
  0xd3   : > { %v969_v31 = vunpack.i.h.bf16 %v967_v61  ;;  %v968_v41 = vunpack.i.l.bf16 %v967_v61 }
  0xd4   : > { %499 = vmatmul.bf16.gmra.mxu1 %v403_v63  ;;  %v950_v63 = vpop.permute.xlu0 %949 }
  0xd5   : > { %v364_v0 = vpop.f32.mrf.mxu0  ;;  %v952_v1 = vunpack.i.h.bf16 %v950_v63  ;;  %v951_v9 = vunpack.i.l.bf16 %v950_v63 }
  0xd6   : > { %v365_v2 = vadd.f32 %v1183_v24, %v364_v0 }
  0xd8   : > { %v392_v6 = vmax.f32 %v365_v2, 0.0 }
  0xdd   : > { %v366_v3 = vpop.f32.mrf.mxu0 }
  0xde   : > { %v367_v4 = vadd.f32 %v1183_v24, %v366_v3  ;;  %v1211_v24 = vld [vmem:[%s1272_s4] ss:$0 sm:$0xff]  ;;  %v947_v3 = vunpack.i.h.bf16 %v945_v55 }
  0xe0   : > { %v393_v7 = vmax.f32 %v367_v4, 0.0 }
  0xe2   : > { %v404_v8 = vpack.c.bf16 %v393_v7, %v392_v6  ;;  %v946_v7 = vunpack.i.l.bf16 %v945_v55 }
  0xe4   : > { %504 = vmatmul.bf16.vlgmr.msra.gmra.mxu2 %v404_v8 }
  0xf4   : > { %509 = vmatmul.bf16.gmra.mxu2 %v405_v18 }
  0xfc   : > { %v972_v29 = vpop.permute.xlu2 %971 }
  0xfd   : > { %v974_v36 = vunpack.i.h.bf16 %v972_v29  ;;  %v973_v42 = vunpack.i.l.bf16 %v972_v29 }
 0x104   : > { %514 = vmatmul.bf16.gmra.mxu2 %v406_v38  ;;  %v977_v38 = vpop.permute.xlu0 %976 }
 0x114   : > { %519 = vmatmul.bf16.gmra.mxu2 %v407_v44 }
 0x121   : > { %v485_v45 = vpop.f32.mrf.mxu1 }
 0x122   : > { %v486_v62 = vadd.f32 %v1211_v24, %v485_v45 }
 0x124   : > { %v525_v12 = vmax.f32 %v486_v62, 0.0 }
 0x129   : > { %v487_v46 = vpop.f32.mrf.mxu1 }
 0x12a   : > { %v488_v59 = vadd.f32 %v1211_v24, %v487_v46  ;;  %v979_v46 = vunpack.i.h.bf16 %v977_v38 }
 0x12c   : > { %v526_v4 = vmax.f32 %v488_v59, 0.0 }
 0x12e   : > { %v622_v20 = vmul.f32 %v947_v3, %v526_v4 }
 0x131   : > { %v490_v47 = vpop.f32.mrf.mxu1 }
 0x132   : > { %v491_v60 = vadd.f32 %v1211_v24, %v490_v47 }
 0x134   : > { %v527_v8 = vmax.f32 %v491_v60, 0.0 }
 0x136   : > { %v623_v25 = vmul.f32 %v951_v9, %v527_v8 }
 0x139   : > { %v492_v48 = vpop.f32.mrf.mxu1 }
 0x13a   : > { %v493_v58 = vadd.f32 %v1211_v24, %v492_v48 }
 0x13c   : > { %v528_v2 = vmax.f32 %v493_v58, 0.0 }
 0x13e   : > { %v624_v16 = vmul.f32 %v952_v1, %v528_v2 }
 0x140   : > { %v644_v34 = vmax.f32 %v623_v25, %v624_v16 }
 0x141   : > { %v495_v49 = vpop.f32.mrf.mxu1 }
 0x142   : > { %v496_v13 = vadd.f32 %v1211_v24, %v495_v49  ;;  %v645_v62 = vrot.slane %v644_v34, 4 }
 0x144   : > { %v529_v30 = vmax.f32 %v496_v13, 0.0  ;;  %v646_v8 = vmax.f32 %v644_v34, %v645_v62 }
 0x146   : > { %v625_v48 = vmul.f32 %v957_v14, %v529_v30 }
 0x149   : > { %v497_v52 = vpop.f32.mrf.mxu1 }
 0x14a   : > { %v498_v5 = vadd.f32 %v1211_v24, %v497_v52  ;;  %v621_v52 = vmul.f32 %v946_v7, %v525_v12 }
 0x14c   : > { %v530_v21 = vmax.f32 %v498_v5, 0.0  ;;  %v637_v58 = vmax.f32 %v621_v52, %v622_v20  ;;  %v982_v20 = vpop.permute.xlu1 %981 }
 0x14d   : > { %v984_v30 = vunpack.i.h.bf16 %v982_v20 }
 0x14e   : > { %v626_v39 = vmul.f32 %v958_v17, %v530_v21  ;;  %v638_v5 = vrot.slane %v637_v58, 4 }
 0x150   : > { %v639_v12 = vmax.f32 %v637_v58, %v638_v5 }
 0x151   : > { %v500_v54 = vpop.f32.mrf.mxu1 }
 0x152   : > { %v501_v18 = vadd.f32 %v1211_v24, %v500_v54 }
 0x154   : > { %v531_v35 = vmax.f32 %v501_v18, 0.0 }
 0x159   : > { %v502_v0 = vpop.f32.mrf.mxu1 }
 0x15a   : > { %v503_v11 = vadd.f32 %v1211_v24, %v502_v0 }
 0x15c   : > { %v532_v27 = vmax.f32 %v503_v11, 0.0 }
 0x15e   : > { %v628_v44 = vmul.f32 %v963_v26, %v532_v27 }
 0x167   : > { %v505_v50 = vpop.f32.mrf.mxu2 }
 0x168   : > { %v506_v23 = vadd.f32 %v1211_v24, %v505_v50 }
 0x16a   : > { %v533_v40 = vmax.f32 %v506_v23, 0.0 }
 0x16c   : > { %v629_v57 = vmul.f32 %v968_v41, %v533_v40 }
 0x16f   : > { %v507_v51 = vpop.f32.mrf.mxu2 }
 0x170   : > { %v508_v15 = vadd.f32 %v1211_v24, %v507_v51  ;;  %v978_v51 = vunpack.i.l.bf16 %v977_v38 }
 0x172   : > { %v534_v32 = vmax.f32 %v508_v15, 0.0  ;;  %v647_v15 = vrot.slane %v646_v8, 2 }
 0x174   : > { %v630_v49 = vmul.f32 %v969_v31, %v534_v32  ;;  %v648_v27 = vmax.f32 %v646_v8, %v647_v15  ;;  %v983_v31 = vunpack.i.l.bf16 %v982_v20 }
 0x176   : > { %v665_v63 = vmax.f32 %v629_v57, %v630_v49  ;;  %v649_v40 = vrot.slane %v648_v27, 1 }
 0x177   : > { %v510_v53 = vpop.f32.mrf.mxu2 }
 0x178   : > { %v511_v28 = vadd.f32 %v1211_v24, %v510_v53  ;;  %v627_v53 = vmul.f32 %v962_v22, %v531_v35  ;;  %v666_v7 = vrot.slane %v665_v63, 4  ;;  %v640_v22 = vrot.slane %v639_v12, 2 }
 0x17a   : > { %v535_v45 = vmax.f32 %v511_v28, 0.0  ;;  %v658_v59 = vmax.f32 %v627_v53, %v628_v44  ;;  %v667_v16 = vmax.f32 %v665_v63, %v666_v7  ;;  %v641_v35 = vmax.f32 %v639_v12, %v640_v22 }
 0x17c   : > { %v631_v60 = vmul.f32 %v973_v42, %v535_v45  ;;  %v668_v28 = vrot.slane %v667_v16, 2  ;;  %v642_v44 = vrot.slane %v641_v35, 1 }
 0x17e   : > { %v643_v53 = vmax.f32 %v641_v35, %v642_v44 }
 0x17f   : > { %v512_v56 = vpop.f32.mrf.mxu2 }
 0x180   : > { %v513_v19 = vadd.f32 %v1211_v24, %v512_v56  ;;  %v651_v56 = vmax.f32 %v625_v48, %v626_v39  ;;  %v669_v39 = vmax.f32 %v667_v16, %v668_v28  ;;  %v650_v48 = vmax.f32 %v648_v27, %v649_v40 }
 0x182   : > { %v536_v37 = vmax.f32 %v513_v19, 0.0  ;;  %v652_v2 = vrot.slane %v651_v56, 4  ;;  %v702_v57 = vsel %vm701_vm2, %v650_v48, %v643_v53 }
 0x184   : > { %v632_v54 = vmul.f32 %v974_v36, %v536_v37  ;;  %v653_v10 = vmax.f32 %v651_v56, %v652_v2 }
 0x186   : > { %v672_v1 = vmax.f32 %v631_v60, %v632_v54  ;;  %v654_v18 = vrot.slane %v653_v10, 2 }
 0x187   : > { %v515_v6 = vpop.f32.mrf.mxu2 }
 0x188   : > { %v516_v33 = vadd.f32 %v1211_v24, %v515_v6  ;;  %v659_v6 = vrot.slane %v658_v59, 4  ;;  %v673_v9 = vrot.slane %v672_v1, 4 }
 0x18a   : > { %v537_v50 = vmax.f32 %v516_v33, 0.0  ;;  %v660_v13 = vmax.f32 %v658_v59, %v659_v6  ;;  %v674_v17 = vmax.f32 %v672_v1, %v673_v9  ;;  %v655_v33 = vmax.f32 %v653_v10, %v654_v18 }
 0x18c   : > { %v633_v0 = vmul.f32 %v978_v51, %v537_v50  ;;  %v661_v23 = vrot.slane %v660_v13, 2  ;;  %v675_v29 = vrot.slane %v674_v17, 2 }
 0x18e   : > { %v662_v36 = vmax.f32 %v660_v13, %v661_v23  ;;  %v676_v41 = vmax.f32 %v674_v17, %v675_v29 }
 0x18f   : > { %v517_v43 = vpop.f32.mrf.mxu2 }
 0x190   : > { %v518_v47 = vadd.f32 %v1211_v24, %v517_v43  ;;  %v656_v43 = vrot.slane %v655_v33, 1  ;;  %v663_v45 = vrot.slane %v662_v36, 1  ;;  %v677_v49 = vrot.slane %v676_v41, 1 }
 0x192   : > { %v538_v55 = vmax.f32 %v518_v47, 0.0  ;;  %v670_v47 = vrot.slane %v669_v39, 1  ;;  %v657_v51 = vmax.f32 %v655_v33, %v656_v43  ;;  %v664_v54 = vmax.f32 %v662_v36, %v663_v45 }
 0x193   : > { %v678_v58 = vmax.f32 %v676_v41, %v677_v49 }
 0x194   : > { %v634_v61 = vmul.f32 %v979_v46, %v538_v55  ;;  %v671_v56 = vmax.f32 %v669_v39, %v670_v47  ;;  %v704_v60 = vsel %vm703_vm3, %v657_v51, %v702_v57 }
 0x195   : > { %v706_v63 = vsel %vm705_vm4, %v664_v54, %v704_v60 }
 0x196   : > { %v679_v3 = vmax.f32 %v633_v0, %v634_v61  ;;  %v708_v0 = vsel %vm707_vm5, %v671_v56, %v706_v63 }
 0x197   : > { %v520_v4 = vpop.f32.mrf.mxu2  ;;  %v710_v2 = vsel %vm709_vm6, %v678_v58, %v708_v0 }
 0x198   : > { %v680_v11 = vrot.slane %v679_v3, 4  ;;  %v521_v14 = vadd.f32 %v1211_v24, %v520_v4 }
 0x19a   : > { %v681_v19 = vmax.f32 %v679_v3, %v680_v11  ;;  %v539_v25 = vmax.f32 %v521_v14, 0.0 }
 0x19c   : > { %v682_v34 = vrot.slane %v681_v19, 2  ;;  %v635_v37 = vmul.f32 %v983_v31, %v539_v25 }
 0x19f   : > { %v522_v21 = vpop.f32.mrf.mxu2 }
 0x1a0   : > { %v523_v26 = vadd.f32 %v1211_v24, %v522_v21  ;;  %v683_v24 = vmax.f32 %v681_v19, %v682_v34 }
 0x1a2   : > { %v540_v32 = vmax.f32 %v523_v26, 0.0  ;;  %v684_v52 = vrot.slane %v683_v24, 1 }
 0x1a4   : > { %v636_v38 = vmul.f32 %v984_v30, %v540_v32  ;;  %v685_v61 = vmax.f32 %v683_v24, %v684_v52 }
 0x1a6   : > { %v686_v42 = vmax.f32 %v635_v37, %v636_v38  ;;  %v712_v3 = vsel %vm711_vm7, %v685_v61, %v710_v2 }
 0x1a8   : > { %v687_v46 = vrot.slane %v686_v42, 4 }
 0x1aa   : > { %v688_v50 = vmax.f32 %v686_v42, %v687_v46 }
 0x1ac   : > { %v689_v55 = vrot.slane %v688_v50, 2 }
 0x1ae   : > { %v690_v59 = vmax.f32 %v688_v50, %v689_v55 }
 0x1b0   : > { %v691_v62 = vrot.slane %v690_v59, 1 }
 0x1b2   : > { %v692_v1 = vmax.f32 %v690_v59, %v691_v62 }
 0x1b4   : > { %v714_v4 = vsel %vm713_vm8, %v692_v1, %v712_v3 }
 0x1b5   : > { %716 = vst [vmem:[%s220_s30] sm:$0xff] %v714_v4 }
 0x1b6   : > { %1014 = shalt.err (!%p1011_p3)
}
 0x1b7   : > { %902 = dma.vmem_to_hbm [thread:$0]  (%p1117_p5), %s731_s6, 128, %s733_s8, %s718_s7  }
 0x1b8 PF: > { %p908_p4 = scmp.ge.s32.totalorder %s1049_s21, 2  ;;  %s744_s16 = sand.u32 1, %s1037_s18  }
 0x1b9   : > { %s745_s17 = scalar_lea.sflag [#allocation3], %s744_s16 }
 0x1ba   : > { %p905_p7 = pnand %p908_p4, %p1121_p6 }
 0x1bc   : > { %p906_p8 = pneg %p905_p7 }
 0x1be   : > { %1032 = dma.done.wait (%p906_p8), %s745_s17, 128  }
 0x1bf   : > { %1034 = vsyncadd (%p906_p8), %s745_s17, 4294967168  ;;  %p15_p9 = scmp.ge.s32.totalorder %s1105_s24, 4   ;;  %s1276_s18 = smov %s1041_s19 }
 0x1c0   : > { %s1277_s19 = smov %s1045_s20  ;;  %s1278_s20 = smov %s1115_s27 }
 0x1c1   : > { %s1279_s21 = smov %s1105_s24  ;;  %17 = sbr.rel (!%p15_p9) target bundleno = 3 (0x3), region = 75 }
 0x1c6   :  { %751 = vsyncpa [#allocation3], 1 }
 0x1c7   :  { %753 = vsyncpa [#allocation3 + $0x1], 1 }

</bundles_post_ra>
